<compile_context>
chip_gen: v6e
topology: v6e:2x2x1
jax: 0.10.0
libtpu: 0.0.40
codegen_flags: <defaults>
</compile_context>

<pallas_src>
import jax
import jax.numpy as jnp
from jax import lax
from jax.experimental import pallas as pl
from jax.experimental.pallas import tpu as pltpu


def _round_up(n, m):
    return ((n + m - 1) // m) * m


# -----------------------------------------------------------------------------
# Conv1d ("same" padding, NCW layout) as a dense linear map on the flattened
# activation:  c_flat = h_flat @ Band + bconv_flat, with
#   Band[i, j] = W[j % depth, i % depth, t],  t = i//depth - j//depth + pad,
#                valid iff 0 <= t < filter_size (zero otherwise)
#   bconv_flat[j] = conv_b[j % depth]
# Being linear, it is folded into linear2 once at setup (all in f32):
#   W2_eff = Band @ W2,   b2_eff = bconv_flat @ W2 + b2.
# -----------------------------------------------------------------------------
def _fold_conv_into_linear2(conv_w, conv_b, w2, b2, depth, seq_len, filter_size):
    d1 = seq_len * depth
    pad = filter_size // 2
    idx = jnp.arange(d1)
    li, ci = idx // depth, idx % depth            # input flat index  i
    lj, co = idx // depth, idx % depth            # output flat index j
    t = li[:, None] - lj[None, :] + pad           # (d1, d1) tap index
    valid = (t >= 0) & (t < filter_size)
    band = jnp.where(
        valid,
        conv_w[co[None, :], ci[:, None], jnp.clip(t, 0, filter_size - 1)],
        0.0,
    ).astype(jnp.float32)                         # Band[i, j]
    bconv_flat = jnp.tile(conv_b.astype(jnp.float32), seq_len)        # (d1,)
    w2f = w2.astype(jnp.float32)
    w2_eff = band @ w2f                                               # (d1, out)
    b2_eff = bconv_flat @ w2f + b2.astype(jnp.float32)                # (out,)
    return w2_eff, b2_eff


# -----------------------------------------------------------------------------
# Pallas kernel: two MXU matmuls with f32 accumulation.
#   x   : (TB, Kp)    bf16/f32
#   w1  : (Kp, D1p)   bf16/f32   (linear1, zero-padded)
#   b1  : (1, D1p)    f32
#   w2  : (D1p, Op)   bf16/f32   (Band @ W2, zero-padded)
#   b2  : (1, Op)     f32        (bconv @ W2 + b2, zero-padded)
#   out : (TB, Op)    out_dtype
# -----------------------------------------------------------------------------
def _hyena_kernel(x_ref, w1_ref, b1_ref, w2_ref, b2_ref, o_ref):
    h = jnp.dot(x_ref[...], w1_ref[...], preferred_element_type=jnp.float32)
    h = (h + b1_ref[...]).astype(w2_ref.dtype)
    out = jnp.dot(h, w2_ref[...], preferred_element_type=jnp.float32)
    o_ref[...] = (out + b2_ref[...]).astype(o_ref.dtype)


def hyena_forward(x, w1, b1, conv_w, conv_b, w2, b2, *, depth, output_dim,
                  filter_size, block_b=512, use_bf16=True,
                  out_dtype=jnp.float32):
    assert filter_size % 2 == 1, (
        "filter_size must be odd so the conv output length equals output_dim+1")
    x = jnp.asarray(x, jnp.float32)
    B, input_dim = x.shape
    seq_len = output_dim + 1
    d1 = seq_len * depth
    assert w1.shape == (input_dim, d1)

    mm_dtype = jnp.bfloat16 if use_bf16 else jnp.float32
    mm_bytes = jnp.dtype(mm_dtype).itemsize
    out_bytes = jnp.dtype(out_dtype).itemsize

    # Lane-dense padding (128 multiples work on every generation).
    kp = _round_up(input_dim, 128)
    d1p = _round_up(d1, 128)
    op = _round_up(output_dim, 128)

    # --- fold the (linear) conv into linear2: one-time f32 setup --------------
    w2_eff, b2_eff = _fold_conv_into_linear2(
        jnp.asarray(conv_w, jnp.float32), jnp.asarray(conv_b, jnp.float32),
        jnp.asarray(w2, jnp.float32), jnp.asarray(b2, jnp.float32),
        depth, seq_len, filter_size)

    w1p = (jnp.zeros((kp, d1p), jnp.float32)
           .at[:input_dim, :d1].set(jnp.asarray(w1, jnp.float32))
           .astype(mm_dtype))
    b1p = jnp.zeros((1, d1p), jnp.float32).at[:, :d1].set(
        jnp.asarray(b1, jnp.float32).reshape(1, d1))
    w2p = (jnp.zeros((d1p, op), jnp.float32)
           .at[:d1, :output_dim].set(w2_eff)
           .astype(mm_dtype))
    b2p = jnp.zeros((1, op), jnp.float32).at[:, :output_dim].set(
        b2_eff.reshape(1, output_dim))

    # --- VMEM-aware batch tile -------------------------------------------------
    vmem_cap = 64 << 20                       # conservative fallback (v7x per-TC)
    try:
        vmem_cap = int(pltpu.get_tpu_info().vmem_capacity_bytes)
    except Exception:
        pass
    # Constant-index weight blocks are still double-buffered by the pipeline,
    # so count them twice.  Per batch-row: x tile (x2 buffers), out tile (x2),
    # plus the f32 h, its mm_dtype copy, and the f32 pre-store result.
    weights_bytes = 2 * ((kp * d1p + d1p * op) * mm_bytes + (d1p + op) * 4)
    per_row_bytes = (2 * kp * mm_bytes + 2 * op * out_bytes
                     + d1p * (4 + mm_bytes) + op * 4)
    vmem_budget = int(vmem_cap * 0.6)
    row_mult = 16 if mm_bytes == 2 else 8
    tb_cap = max(row_mult,
                 ((vmem_budget - weights_bytes) // per_row_bytes)
                 // row_mult * row_mult)

    bp0 = _round_up(B, row_mult)
    tb = min(block_b, bp0, tb_cap)
    if bp0 >= 2 * row_mult:                   # >= 2 grid steps -> both v7x TCs busy
        tb = min(tb, _round_up(pl.cdiv(bp0, 2), row_mult))
    tb = max(row_mult, tb // row_mult * row_mult)
    bp = _round_up(B, tb)
    grid = (bp // tb,)

    xp = jnp.pad(x.astype(mm_dtype), ((0, bp - B), (0, kp - input_dim)))

    flops = 2 * bp * d1p * (kp + op)
    bytes_accessed = (xp.size * mm_bytes
                      + w1p.size * mm_bytes + b1p.size * 4
                      + w2p.size * mm_bytes + b2p.size * 4
                      + bp * op * out_bytes)

    out_p = pl.pallas_call(
        _hyena_kernel,
        out_shape=jax.ShapeDtypeStruct((bp, op), out_dtype),
        grid=grid,
        in_specs=[
            pl.BlockSpec((tb, kp), lambda i: (i, 0)),      # x: batch-tiled
            pl.BlockSpec((kp, d1p), lambda i: (0, 0)),     # weights: VMEM-resident
            pl.BlockSpec((1, d1p), lambda i: (0, 0)),
            pl.BlockSpec((d1p, op), lambda i: (0, 0)),
            pl.BlockSpec((1, op), lambda i: (0, 0)),
        ],
        out_specs=pl.BlockSpec((tb, op), lambda i: (i, 0)),
        compiler_params=pltpu.CompilerParams(
            dimension_semantics=("parallel",),
            vmem_limit_bytes=int(min(vmem_cap * 0.9, 110 << 20)),
        ),
        cost_estimate=pl.CostEstimate(flops=int(flops), transcendentals=0,
                                      bytes_accessed=int(bytes_accessed)),
    )(xp, w1p, b1p, w2p, b2p)

    return out_p[:B, :output_dim]


# -----------------------------------------------------------------------------
# Pure-JAX reference (mirrors the PyTorch forward exactly) for verification.
# -----------------------------------------------------------------------------
def hyena_reference(x, w1, b1, conv_w, conv_b, w2, b2, *, depth, output_dim,
                    filter_size):
    x = x.astype(jnp.float32)
    B = x.shape[0]
    seq_len = output_dim + 1
    pad = filter_size // 2
    h = x @ w1 + b1                                        # (B, D1)
    h3 = h.reshape(B, seq_len, depth).transpose(0, 2, 1)   # (B, depth, L)  NCW
    c = lax.conv_general_dilated(
        h3, conv_w, window_strides=(1,), padding=[(pad, pad)],
        dimension_numbers=("NCH", "OIH", "NCH"))
    c = c + conv_b[None, :, None]                          # (B, depth, L)
    cf = c.transpose(0, 2, 1).reshape(B, -1)               # (B, D1)
    return cf @ w2 + b2


# -----------------------------------------------------------------------------
# Deterministic parameter init (PyTorch-default-style uniform) + smoke test.
# -----------------------------------------------------------------------------
def init_params(key, input_dim, output_dim, filter_size, depth):
    d1 = (output_dim + 1) * depth
    ks = jax.random.split(key, 6)

    def unif(k, shape, fan_in):
        bound = 1.0 / jnp.sqrt(float(fan_in))
        return jax.random.uniform(k, shape, jnp.float32, -bound, bound)

    w1 = unif(ks[0], (input_dim, d1), input_dim)
    b1 = unif(ks[1], (d1,), input_dim)
    conv_w = unif(ks[2], (depth, depth, filter_size), depth * filter_size)
    conv_b = unif(ks[3], (depth,), depth * filter_size)
    w2 = unif(ks[4], (d1, output_dim), d1)
    b2 = unif(ks[5], (output_dim,), d1)
    return w1, b1, conv_w, conv_b, w2, b2


if __name__ == "__main__":
    batch, input_dim, output_dim, filter_size, depth = 8, 32, 16, 3, 4

    key = jax.random.PRNGKey(0)
    kx, kp = jax.random.split(key)
    x = jax.random.normal(kx, (batch, input_dim), jnp.float32)
    params = init_params(kp, input_dim, output_dim, filter_size, depth)

    ref = hyena_reference(x, *params, depth=depth, output_dim=output_dim,
                          filter_size=filter_size)

    # Primary (bf16 MXU) path.
    out = hyena_forward(x, *params, depth=depth, output_dim=output_dim,
                        filter_size=filter_size)
    out = jax.block_until_ready(out)
    assert out.shape == (batch, output_dim)
    # bf16 operands with f32 accumulation -> relaxed tolerance vs f32 reference.
    assert jnp.allclose(out, ref, atol=2e-2, rtol=2e-2), "bf16 kernel mismatch"

    # f32 path: tight structural check of the conv-into-linear2 fold.
    out_f32 = hyena_forward(x, *params, depth=depth, output_dim=output_dim,
                            filter_size=filter_size, use_bf16=False)
    out_f32 = jax.block_until_ready(out_f32)
    assert jnp.allclose(out_f32, ref, atol=1e-3, rtol=1e-3), "f32 kernel mismatch"

    print("KERNEL_OK")
</pallas_src>

<mosaic_0001>
module attributes {stable_mosaic.version = 11 : i64} {
  func.func @_hyena_kernel(%arg0: i32, %arg1: memref<16x128xbf16, #tpu.memory_space<vmem>>, %arg2: memref<128x128xbf16, #tpu.memory_space<vmem>>, %arg3: memref<1x128xf32, #tpu.memory_space<vmem>>, %arg4: memref<128x128xbf16, #tpu.memory_space<vmem>>, %arg5: memref<1x128xf32, #tpu.memory_space<vmem>>, %arg6: memref<16x128xf32, #tpu.memory_space<vmem>>) attributes {dimension_semantics = [#tpu.dimension_semantics<parallel>], iteration_bounds = array<i64: 1>, scalar_prefetch = 0 : i64, scratch_operands = 0 : i64, tpu.core_type = #tpu.core_type<tc>, window_params = [{transform_indices = @transform_0, window_bounds = array<i64: 16, 128>}, {pipeline_mode = #tpu.pipeline_mode<synchronous>, transform_indices = @transform_1, window_bounds = array<i64: 128, 128>}, {pipeline_mode = #tpu.pipeline_mode<synchronous>, transform_indices = @transform_2, window_bounds = array<i64: 1, 128>}, {pipeline_mode = #tpu.pipeline_mode<synchronous>, transform_indices = @transform_3, window_bounds = array<i64: 128, 128>}, {pipeline_mode = #tpu.pipeline_mode<synchronous>, transform_indices = @transform_4, window_bounds = array<i64: 1, 128>}, {transform_indices = @transform_5, window_bounds = array<i64: 16, 128>}]} {
    %c0 = arith.constant 0 : index
    %c0_0 = arith.constant 0 : index
    %0 = vector.load %arg1[%c0, %c0_0] : memref<16x128xbf16, #tpu.memory_space<vmem>>, vector<16x128xbf16>
    %c0_1 = arith.constant 0 : index
    %c0_2 = arith.constant 0 : index
    %1 = vector.load %arg2[%c0_1, %c0_2] : memref<128x128xbf16, #tpu.memory_space<vmem>>, vector<128x128xbf16>
    %cst = arith.constant dense<0.000000e+00> : vector<16x128xf32>
    %2 = tpu.matmul %0, %1, %cst {dimension_numbers = #tpu.dot_dimension_numbers<[1], [0], [0], [1], [0, 0, 1, 1], [], []>} : vector<16x128xbf16>, vector<128x128xbf16>, vector<16x128xf32> -> vector<16x128xf32>
    %c0_3 = arith.constant 0 : index
    %c0_4 = arith.constant 0 : index
    %3 = vector.load %arg3[%c0_3, %c0_4] : memref<1x128xf32, #tpu.memory_space<vmem>>, vector<1x128xf32>
    %4 = vector.broadcast %3 : vector<1x128xf32> to vector<16x128xf32>
    %5 = arith.addf %2, %4 : vector<16x128xf32>
    %6 = arith.truncf %5 : vector<16x128xf32> to vector<16x128xbf16>
    %c0_5 = arith.constant 0 : index
    %c0_6 = arith.constant 0 : index
    %7 = vector.load %arg4[%c0_5, %c0_6] : memref<128x128xbf16, #tpu.memory_space<vmem>>, vector<128x128xbf16>
    %cst_7 = arith.constant dense<0.000000e+00> : vector<16x128xf32>
    %8 = tpu.matmul %6, %7, %cst_7 {dimension_numbers = #tpu.dot_dimension_numbers<[1], [0], [0], [1], [0, 0, 1, 1], [], []>} : vector<16x128xbf16>, vector<128x128xbf16>, vector<16x128xf32> -> vector<16x128xf32>
    %c0_8 = arith.constant 0 : index
    %c0_9 = arith.constant 0 : index
    %9 = vector.load %arg5[%c0_8, %c0_9] : memref<1x128xf32, #tpu.memory_space<vmem>>, vector<1x128xf32>
    %10 = vector.broadcast %9 : vector<1x128xf32> to vector<16x128xf32>
    %11 = arith.addf %8, %10 : vector<16x128xf32>
    %c0_10 = arith.constant 0 : index
    %c0_11 = arith.constant 0 : index
    %12 = vector.load %arg6[%c0_10, %c0_11] : memref<16x128xf32, #tpu.memory_space<vmem>>, vector<16x128xf32>
    tpu.vector_store %arg6[%c0_10, %c0_11], %11 {strides = array<i32>} : memref<16x128xf32, #tpu.memory_space<vmem>>, vector<16x128xf32>,
    return
  }
  func.func @transform_0(%arg0: i32) -> (i32, i32) {
    %c0_i32 = arith.constant 0 : i32
    %c0_i32_0 = arith.constant 0 : i32
    return %arg0, %c0_i32 : i32, i32
  }
  func.func @transform_1(%arg0: i32) -> (i32, i32) {
    %c0_i32 = arith.constant 0 : i32
    %c0_i32_0 = arith.constant 0 : i32
    %c0_i32_1 = arith.constant 0 : i32
    return %c0_i32, %c0_i32_0 : i32, i32
  }
  func.func @transform_2(%arg0: i32) -> (i32, i32) {
    %c0_i32 = arith.constant 0 : i32
    %c0_i32_0 = arith.constant 0 : i32
    %c0_i32_1 = arith.constant 0 : i32
    return %c0_i32, %c0_i32_0 : i32, i32
  }
  func.func @transform_3(%arg0: i32) -> (i32, i32) {
    %c0_i32 = arith.constant 0 : i32
    %c0_i32_0 = arith.constant 0 : i32
    %c0_i32_1 = arith.constant 0 : i32
    return %c0_i32, %c0_i32_0 : i32, i32
  }
  func.func @transform_4(%arg0: i32) -> (i32, i32) {
    %c0_i32 = arith.constant 0 : i32
    %c0_i32_0 = arith.constant 0 : i32
    %c0_i32_1 = arith.constant 0 : i32
    return %c0_i32, %c0_i32_0 : i32, i32
  }
  func.func @transform_5(%arg0: i32) -> (i32, i32) {
    %c0_i32 = arith.constant 0 : i32
    %c0_i32_0 = arith.constant 0 : i32
    return %arg0, %c0_i32 : i32, i32
  }
}

</mosaic_0001>

<bundles_post_ra>
// kernel: tpu_custom_call.1
= control target key start
LH: loop header
LB: loop body
LE: loop exit
PB: predicated region body
PF: predicated region fallthrough
CT: control target
= control target key end

     0   :  { %10 = vsyncpa [#allocation3], 0  ;;  %s564_s0 = inlined_call_operand.hbm [shape: bf16[16,128], index: 0, kind: input, shape index: {}]   ;;  %s565_s1 = inlined_call_operand.hbm [shape: bf16[128,128], index: 1, kind: input, shape index: {}]   ;;  %s566_s2 = inlined_call_operand.vmem [shape: f32[1,128], index: 2, kind: input, shape index: {}]   ;;  %s567_s3 = inlined_call_operand.hbm [shape: bf16[128,128], index: 3, kind: input, shape index: {}]   ;;  %s568_s4 = inlined_call_operand.vmem [shape: f32[1,128], index: 4, kind: input, shape index: {}]   ;;  %s569_s5 = inlined_call_operand.hbm [shape: f32[16,128], index: 5, kind: output, shape index: {}]  }
   0x1   :  { %11 = vsyncpa [#allocation6], 0 }
   0x2   :  { %12 = vsyncpa [#allocation4], 0  ;;  %s506_s18 = smov [#allocation5]   ;;  %s507_s20 = smov [#allocation2]  }
   0x3   :  { %s30_s19 = sshll.u32 %s506_s18, 4  ;;  %s18_s21 = sshll.u32 %s507_s20, 4  ;;  %s31_s19 = int_to_ptr.vmem [resolvable:$true] %s30_s19  ;;  %s19_s21 = int_to_ptr.vmem [resolvable:$true] %s18_s21 }
   0x4   :  { %s428_s22 = scalar_lea.vmem %s31_s19, 1024  ;;  %p433_p1 = scmp.lt.s32.totalorder %s31_s19, %s31_s19 }
   0x5   :  { %p429_p0 = scmp.ne.s32.totalorder %s31_s19, %s428_s22  ;;  %p434_p2 = scmp.lt.s32.totalorder %s428_s22, %s428_s22 }
   0x7   :  { %p435_p3 = por %p434_p2, %p433_p1 }
   0x9   :  { %p436_p4 = pnand %p435_p3, %p429_p0 }
   0xb   :  { %439 = shalt.err (!%p436_p4)
}
   0xc   :  { %s508_s23 = smov 64   ;;  %s509_s24 = smov 4  }
   0xd   :  { %36 = dma.hbm_to_vmem [thread:$0]  %s565_s1, 1024, %s31_s19, [#allocation6], %s508_s23, %s508_s23, %s509_s24  }
   0xe   :  { %s448_s27 = scalar_lea.vmem %s19_s21, 128  ;;  %p453_p6 = scmp.lt.s32.totalorder %s19_s21, %s19_s21 }
   0xf   :  { %p449_p5 = scmp.ne.s32.totalorder %s19_s21, %s448_s27  ;;  %p454_p7 = scmp.lt.s32.totalorder %s448_s27, %s448_s27 }
  0x11   :  { %p455_p8 = por %p454_p7, %p453_p6 }
  0x13   :  { %p456_p9 = pnand %p455_p8, %p449_p5 }
  0x15   :  { %459 = shalt.err (!%p456_p9)
}
  0x16   :  { %24 = dma.hbm_to_vmem [thread:$0]  %s564_s0, 128, %s19_s21, [#allocation3], %s508_s23, %s508_s23, %s509_s24  }
  0x17   :  { %s510_s30 = smov [#allocation7]  }
  0x18   :  { %s44_s6 = sshll.u32 %s510_s30, 4  ;;  %s45_s6 = int_to_ptr.vmem [resolvable:$true] %s44_s6 }
  0x19   :  { %s468_s7 = scalar_lea.vmem %s45_s6, 1024  ;;  %p473_p11 = scmp.lt.s32.totalorder %s45_s6, %s45_s6 }
  0x1a   :  { %p469_p10 = scmp.ne.s32.totalorder %s45_s6, %s468_s7  ;;  %p474_p12 = scmp.lt.s32.totalorder %s468_s7, %s468_s7 }
  0x1c   :  { %p475_p13 = por %p474_p12, %p473_p11 }
  0x1e   :  { %p476_p0 = pnand %p475_p13, %p469_p10 }
  0x20   :  { %479 = shalt.err (!%p476_p0)
}
  0x21   :  { %50 = dma.hbm_to_vmem [thread:$0]  %s567_s3, 1024, %s45_s6, [#allocation6], %s508_s23, %s508_s23, %s509_s24  }
  0x22   :  { %500 = dma.done.wait [#allocation3], 128  }
  0x23   :  { %501 = vsyncadd [#allocation3], 4294967168 }
  0x24   :  { %502 = dma.done.wait [#allocation6], 2048  }
  0x25   :  { %503 = vsyncadd [#allocation6], 4294965248  ;;  %v511_v0 = vmov 0.0   ;;  %vm512_vm0 = vmmov 0   ;;  %v403_v1 = vld [vmem:[#allocation5 + $0x38] sm:$0xff]   ;;  %v404_v2 = vld [vmem:[#allocation5 + $0x30] sm:$0xff]  }
  0x26   :  { %353 = vmatprep.subr.bf16.mxu0 %v511_v0  ;;  %369 = vmatprep.mubr.msk.bf16.mxu0 %vm512_vm0, %v511_v0  ;;  %v405_v3 = vld [vmem:[#allocation5 + $0x28] sm:$0xff]   ;;  %v412_v4 = vld [vmem:[#allocation7 + $0x38] sm:$0xff]   ;;  %v406_v5 = vld [vmem:[#allocation5 + $0x20] sm:$0xff]   ;;  %s513_s11 = smov [#allocation8]  }
  0x27   :  { %373 = vmatprep.subr.bf16.mxu1 %v511_v0  ;;  %389 = vmatprep.mubr.msk.bf16.mxu1 %vm512_vm0, %v511_v0  ;;  %v413_v6 = vld [vmem:[#allocation7 + $0x30] sm:$0xff]   ;;  %v407_v7 = vld [vmem:[#allocation5 + $0x18] sm:$0xff]   ;;  %v414_v8 = vld [vmem:[#allocation7 + $0x28] sm:$0xff]   ;;  %s303_s12 = sshll.u32 %s513_s11, 4  ;;  %s304_s12 = int_to_ptr.vmem [resolvable:$true] %s303_s12 }
  0x28   :  { %354 = vmatpush3.bf16.msra.mxu0 %v403_v1  ;;  %374 = vmatpush3.bf16.msra.mxu1 %v412_v4  ;;  %v408_v9 = vld [vmem:[#allocation5 + $0x10] sm:$0xff]   ;;  %v415_v10 = vld [vmem:[#allocation7 + $0x20] sm:$0xff]   ;;  %v409_v11 = vld [vmem:[#allocation5 + $0x8] sm:$0xff]   ;;  %p485_p2 = scmp.lt.s32.totalorder %s304_s12, %s304_s12 }
  0x29   :  { %355 = vmatprep.subr.bf16.mxu0 %v511_v0  ;;  %375 = vmatprep.subr.bf16.mxu1 %v511_v0  ;;  %v416_v12 = vld [vmem:[#allocation7 + $0x18] sm:$0xff]   ;;  %v410_v13 = vld [vmem:[#allocation5] sm:$0xff]   ;;  %v417_v14 = vld [vmem:[#allocation7 + $0x10] sm:$0xff]  }
  0x2a   :  { %v411_v15 = vld [vmem:[#allocation2] sm:$0xff]   ;;  %v418_v16 = vld [vmem:[#allocation7 + $0x8] sm:$0xff]   ;;  %v419_v17 = vld [vmem:[#allocation7] sm:$0xff]  }
  0x2b   :  { %v316_v19 = vld [vmem:[%s566_s2] ss:$0 sm:$0xff]  ;;  %s480_s2 = scalar_lea.vmem %s304_s12, 256 }
  0x2c   :  { %356 = vmatpush3.bf16.msra.mxu0 %v404_v2  ;;  %376 = vmatpush3.bf16.msra.mxu1 %v413_v6  ;;  %v326_v26 = vld [vmem:[%s568_s4] ss:$0 sm:$0xff]  ;;  %p481_p1 = scmp.ne.s32.totalorder %s304_s12, %s480_s2  ;;  %p486_p3 = scmp.lt.s32.totalorder %s480_s2, %s480_s2 }
  0x2d   :  { %357 = vmatprep.subr.bf16.mxu0 %v511_v0  ;;  %377 = vmatprep.subr.bf16.mxu1 %v511_v0 }
  0x2e   :  { %p487_p4 = por %p486_p3, %p485_p2 }
  0x30   :  { %358 = vmatpush3.bf16.msra.mxu0 %v405_v3  ;;  %378 = vmatpush3.bf16.msra.mxu1 %v414_v8  ;;  %p488_p5 = pnand %p487_p4, %p481_p1 }
  0x31   :  { %359 = vmatprep.subr.bf16.mxu0 %v511_v0  ;;  %379 = vmatprep.subr.bf16.mxu1 %v511_v0 }
  0x34   :  { %360 = vmatpush3.bf16.msra.mxu0 %v406_v5  ;;  %380 = vmatpush3.bf16.msra.mxu1 %v415_v10 }
  0x35   :  { %361 = vmatprep.subr.bf16.mxu0 %v511_v0  ;;  %381 = vmatprep.subr.bf16.mxu1 %v511_v0 }
  0x38   :  { %362 = vmatpush3.bf16.msra.mxu0 %v407_v7  ;;  %382 = vmatpush3.bf16.msra.mxu1 %v416_v12 }
  0x39   :  { %363 = vmatprep.subr.bf16.mxu0 %v511_v0  ;;  %383 = vmatprep.subr.bf16.mxu1 %v511_v0 }
  0x3c   :  { %364 = vmatpush3.bf16.msra.mxu0 %v408_v9  ;;  %384 = vmatpush3.bf16.msra.mxu1 %v417_v14 }
  0x3d   :  { %365 = vmatprep.subr.bf16.mxu0 %v511_v0  ;;  %385 = vmatprep.subr.bf16.mxu1 %v511_v0 }
  0x40   :  { %366 = vmatpush3.bf16.msra.mxu0 %v409_v11  ;;  %386 = vmatpush3.bf16.msra.mxu1 %v418_v16 }
  0x41   :  { %367 = vmatprep.subr.bf16.mxu0 %v511_v0  ;;  %387 = vmatprep.subr.bf16.mxu1 %v511_v0 }
  0x44   :  { %368 = vmatpush3.bf16.msra.mxu0 %v410_v13  ;;  %388 = vmatpush3.bf16.msra.mxu1 %v419_v17 }
  0x47   :  { %370 = vmatmul.mubr.bf16.vlgmr.msra.gmra.mxu0 %v411_v15 }
 0x107   :  { %v176_v18 = vpop.f32.mrf.mxu0 }
 0x108   :  { %v177_v22 = vadd.f32 %v316_v19, %v176_v18 }
 0x109   :  { %v371_v20 = vpop.f32.mrf.mxu0 }
 0x10b   :  { %v179_v21 = vpop.f32.mrf.mxu0 }
 0x10c   :  { %v180_v23 = vadd.f32 %v316_v19, %v179_v21 }
 0x10d   :  { %v372_v24 = vpop.f32.mrf.mxu0 }
 0x10e   :  { %v183_v25 = vpack.c.bf16 %v180_v23, %v177_v22 }
 0x110   :  { %390 = vmatmul.mubr.bf16.vlgmr.msra.gmra.mxu1 %v183_v25 }
 0x1d0   :  { %v289_v27 = vpop.f32.mrf.mxu1 }
 0x1d1   :  { %v290_v28 = vadd.f32 %v326_v26, %v289_v27 }
 0x1d2   :  { %v391_v29 = vpop.f32.mrf.mxu1 }
 0x1d3   :  { %296 = vst [vmem:[#allocation8] sm:$0xff] %v290_v28 }
 0x1d4   :  { %v292_v30 = vpop.f32.mrf.mxu1 }
 0x1d5   :  { %v293_v31 = vadd.f32 %v326_v26, %v292_v30 }
 0x1d6   :  { %v392_v32 = vpop.f32.mrf.mxu1 }
 0x1d7   :  { %297 = vst [vmem:[#allocation8 + $0x8] sm:$0xff] %v293_v31 }
 0x1d8   :  { %491 = shalt.err (!%p488_p5)
}
 0x1d9   :  { %s514_s13 = smov 128   ;;  %s515_s4 = smov 8  }
 0x1da   :  { %309 = dma.vmem_to_hbm [thread:$0]  %s304_s12, 256, %s569_s5, [#allocation4], %s514_s13, %s514_s13, %s515_s4  }
 0x1db   :  { %504 = dma.done.wait [#allocation4], 256  }
 0x1dc   :  { %505 = vsyncadd [#allocation4], 4294967040 }
 0x1dd   :  { %313 = vsyncpa [#allocation3], 1 }
 0x1de   :  { %314 = vsyncpa [#allocation6], 1 }
 0x1df   :  { %315 = vsyncpa [#allocation4], 1 }

</bundles_post_ra>
